<compile_context>
chip_gen: v6e
topology: v6e:2x2x1
jax: 0.10.0
libtpu: 0.0.40
codegen_flags: <defaults>
</compile_context>

<pallas_src>
import functools

import jax
import jax.numpy as jnp
from jax.experimental import pallas as pl
from jax.experimental.pallas import tpu as pltpu


# ---------------------------------------------------------------------------
# Kernel
# ---------------------------------------------------------------------------
def highway_kernel(x_ref, w_ref, b_ref, o_ref, *, compute_dtype):
    x = x_ref[...]                                   # (TM, D)
    d = x.shape[-1]

    xm = x if compute_dtype is None else x.astype(compute_dtype)
    # One fused matmul: (TM, D) @ (D, 2D) -> (TM, 2D) f32 accumulation.
    y = jnp.dot(xm, w_ref[...], preferred_element_type=jnp.float32)
    y = y + b_ref[...].astype(jnp.float32)

    proj = jnp.maximum(y[:, :d], 0.0)                # relu branch   (TM, D)
    gate = jax.nn.sigmoid(y[:, d:])                  # gate branch   (TM, D), EUP exp

    x32 = x.astype(jnp.float32)
    out = x32 + gate * (proj - x32)                  # highway combine (1 mul, 1 add, 1 sub)
    o_ref[...] = out.astype(o_ref.dtype)


# ---------------------------------------------------------------------------
# Tile selection / VMEM budgeting
# ---------------------------------------------------------------------------
_VMEM_BUDGET = 48 * 1024 * 1024      # keep under v7x's 64 MiB with headroom


def _round_up(x, m):
    return (x + m - 1) // m * m


def _vmem_estimate(tm, d, itemsize):
    w = 2 * (d * 2 * d) * itemsize          # fused weight (assume double-buffered)
    b = 2 * (2 * d) * itemsize              # fused bias
    xo = 2 * 2 * tm * d * itemsize          # x and out tiles, double-buffered
    inter = tm * 2 * d * 4                  # f32 fused matmul result
    return w + b + xo + inter


def _pick_tm(n, d, itemsize):
    n8 = _round_up(n, 8)
    for tm in (512, 256, 128, 64, 32, 16, 8):
        if tm > n8:
            continue
        if _vmem_estimate(tm, d, itemsize) > _VMEM_BUDGET:
            continue
        # Prefer >= 4 grid steps (v7x megacore) unless that would force tm < 128.
        if tm > 128 and pl.cdiv(n8, tm) < 4:
            continue
        return tm
    return 8


# ---------------------------------------------------------------------------
# Wrapper
# ---------------------------------------------------------------------------
def highway(x, w_proj, b_proj, w_trans, b_trans, *, tm=None, compute_dtype=None):
    """x: (N, D). w_*: (D, D) PyTorch layout (out, in). b_*: (D,)."""
    N, D = x.shape
    itemsize = jnp.dtype(x.dtype).itemsize

    if tm is None:
        tm = _pick_tm(N, D, itemsize)

    # Pad ragged N to a multiple of the row tile (padded rows are sliced off).
    N_pad = _round_up(N, tm)
    x_p = x if N_pad == N else jnp.pad(x, ((0, N_pad - N), (0, 0)))

    # Fuse the two linears into one (D, 2D) weight + (1, 2D) bias (x @ W^T layout).
    w_fused = jnp.concatenate([w_proj.T, w_trans.T], axis=1)        # (D, 2D)
    if compute_dtype is not None:
        w_fused = w_fused.astype(compute_dtype)
    b_fused = jnp.concatenate([b_proj, b_trans]).reshape(1, 2 * D)  # (1, 2D), stays f32

    grid = (N_pad // tm,)

    # Advisory cost for XLA scheduling around the custom call.
    w_bytes = w_fused.size * jnp.dtype(w_fused.dtype).itemsize
    cost = pl.CostEstimate(
        flops=4 * N_pad * D * D,                       # one (N,D)x(D,2D) matmul
        transcendentals=N_pad * D,                     # sigmoid exp
        bytes_accessed=2 * N_pad * D * itemsize + w_bytes + b_fused.size * 4,
    )

    # Raise the scoped VMEM limit only when the estimate exceeds the 32 MiB default.
    est = _vmem_estimate(tm, D, itemsize)
    vmem_limit = min(int(est * 1.3), 64 * 1024 * 1024) if est > 30 * 1024 * 1024 else None

    kernel = functools.partial(highway_kernel, compute_dtype=compute_dtype)

    out = pl.pallas_call(
        kernel,
        out_shape=jax.ShapeDtypeStruct((N_pad, D), x.dtype),
        grid_spec=pltpu.PrefetchScalarGridSpec(
            num_scalar_prefetch=0,
            grid=grid,
            in_specs=[
                pl.BlockSpec((tm, D), lambda i: (i, 0)),       # x tile (streamed)
                pl.BlockSpec((D, 2 * D), lambda i: (0, 0)),    # fused weight (resident)
                pl.BlockSpec((1, 2 * D), lambda i: (0, 0)),    # fused bias   (resident)
            ],
            out_specs=pl.BlockSpec((tm, D), lambda i: (i, 0)),
        ),
        compiler_params=pltpu.CompilerParams(
            dimension_semantics=("parallel",),
            vmem_limit_bytes=vmem_limit,
        ),
        cost_estimate=cost,
    )(x_p, w_fused, b_fused)

    return out if N_pad == N else out[:N]


# ---------------------------------------------------------------------------
# Pure-JAX reference
# ---------------------------------------------------------------------------
def highway_ref(x, w_proj, b_proj, w_trans, b_trans):
    proj = jax.nn.relu(x @ w_proj.T + b_proj)
    gate = jax.nn.sigmoid(x @ w_trans.T + b_trans)
    return gate * proj + (1.0 - gate) * x


if __name__ == "__main__":
    key = jax.random.PRNGKey(0)
    N, D = 200, 128          # ragged N exercises the padding path; input_size = 128

    k_x, k_wp, k_bp, k_wt = jax.random.split(key, 4)
    x = jax.random.normal(k_x, (N, D), dtype=jnp.float32)

    # Deterministic synthetic parameters (nn.Linear shapes / init style).
    bound = 1.0 / (D ** 0.5)
    w_proj = jax.random.uniform(k_wp, (D, D), jnp.float32, -bound, bound)
    b_proj = jax.random.uniform(k_bp, (D,), jnp.float32, -bound, bound)
    w_trans = jax.random.uniform(k_wt, (D, D), jnp.float32, -bound, bound)
    b_trans = jnp.full((D,), -2.0, dtype=jnp.float32)   # transform.bias.data.fill_(-2.0)

    out = highway(x, w_proj, b_proj, w_trans, b_trans)
    jax.block_until_ready(out)

    ref = highway_ref(x, w_proj, b_proj, w_trans, b_trans)
    assert out.shape == (N, D)
    assert jnp.allclose(out, ref, atol=1e-5, rtol=1e-5), "mismatch vs reference"

    print("KERNEL_OK")
</pallas_src>

<mosaic_0001>
module attributes {stable_mosaic.version = 11 : i64} {
  func.func @highway_kernel(%arg0: i32, %arg1: memref<128x128xf32, #tpu.memory_space<vmem>>, %arg2: memref<128x256xf32, #tpu.memory_space<vmem>>, %arg3: memref<1x256xf32, #tpu.memory_space<vmem>>, %arg4: memref<128x128xf32, #tpu.memory_space<vmem>>) attributes {dimension_semantics = [#tpu.dimension_semantics<parallel>], iteration_bounds = array<i64: 2>, scalar_prefetch = 0 : i64, scratch_operands = 0 : i64, tpu.core_type = #tpu.core_type<tc>, window_params = [{transform_indices = @transform_0, window_bounds = array<i64: 128, 128>}, {pipeline_mode = #tpu.pipeline_mode<synchronous>, transform_indices = @transform_1, window_bounds = array<i64: 128, 256>}, {pipeline_mode = #tpu.pipeline_mode<synchronous>, transform_indices = @transform_2, window_bounds = array<i64: 1, 256>}, {transform_indices = @transform_3, window_bounds = array<i64: 128, 128>}]} {
    %c0 = arith.constant 0 : index
    %c0_0 = arith.constant 0 : index
    %0 = vector.load %arg1[%c0, %c0_0] : memref<128x128xf32, #tpu.memory_space<vmem>>, vector<128x128xf32>
    %c0_1 = arith.constant 0 : index
    %c0_2 = arith.constant 0 : index
    %1 = vector.load %arg2[%c0_1, %c0_2] : memref<128x256xf32, #tpu.memory_space<vmem>>, vector<128x256xf32>
    %cst = arith.constant dense<0.000000e+00> : vector<128x256xf32>
    %2 = tpu.matmul %0, %1, %cst {dimension_numbers = #tpu.dot_dimension_numbers<[1], [0], [0], [1], [0, 0, 1, 1], [], []>} : vector<128x128xf32>, vector<128x256xf32>, vector<128x256xf32> -> vector<128x256xf32>
    %c0_3 = arith.constant 0 : index
    %c0_4 = arith.constant 0 : index
    %3 = vector.load %arg3[%c0_3, %c0_4] : memref<1x256xf32, #tpu.memory_space<vmem>>, vector<1x256xf32>
    %4 = vector.broadcast %3 : vector<1x256xf32> to vector<128x256xf32>
    %5 = arith.addf %2, %4 : vector<128x256xf32>
    %6 = vector.extract_strided_slice %5 {offsets = [0, 0], sizes = [128, 128], strides = [1, 1]} : vector<128x256xf32> to vector<128x128xf32>
    %cst_5 = arith.constant 0.000000e+00 : f32
    %7 = vector.broadcast %cst_5 : f32 to vector<128x128xf32>
    %8 = arith.maximumf %6, %7 : vector<128x128xf32>
    %9 = vector.extract_strided_slice %5 {offsets = [0, 128], sizes = [128, 128], strides = [1, 1]} : vector<128x256xf32> to vector<128x128xf32>
    %10 = arith.negf %9 : vector<128x128xf32>
    %11 = math.exp %10 : vector<128x128xf32>
    %cst_6 = arith.constant 1.000000e+00 : f32
    %12 = vector.broadcast %cst_6 : f32 to vector<128x128xf32>
    %13 = arith.addf %12, %11 : vector<128x128xf32>
    %14 = arith.divf %12, %13 : vector<128x128xf32>
    %15 = arith.subf %8, %0 : vector<128x128xf32>
    %16 = arith.mulf %14, %15 : vector<128x128xf32>
    %17 = arith.addf %0, %16 : vector<128x128xf32>
    %c0_7 = arith.constant 0 : index
    %c0_8 = arith.constant 0 : index
    %18 = vector.load %arg4[%c0_7, %c0_8] : memref<128x128xf32, #tpu.memory_space<vmem>>, vector<128x128xf32>
    tpu.vector_store %arg4[%c0_7, %c0_8], %17 {strides = array<i32>} : memref<128x128xf32, #tpu.memory_space<vmem>>, vector<128x128xf32>,
    return
  }
  func.func @transform_0(%arg0: i32) -> (i32, i32) {
    %c0_i32 = arith.constant 0 : i32
    %c0_i32_0 = arith.constant 0 : i32
    return %arg0, %c0_i32 : i32, i32
  }
  func.func @transform_1(%arg0: i32) -> (i32, i32) {
    %c0_i32 = arith.constant 0 : i32
    %c0_i32_0 = arith.constant 0 : i32
    %c0_i32_1 = arith.constant 0 : i32
    return %c0_i32, %c0_i32_0 : i32, i32
  }
  func.func @transform_2(%arg0: i32) -> (i32, i32) {
    %c0_i32 = arith.constant 0 : i32
    %c0_i32_0 = arith.constant 0 : i32
    %c0_i32_1 = arith.constant 0 : i32
    return %c0_i32, %c0_i32_0 : i32, i32
  }
  func.func @transform_3(%arg0: i32) -> (i32, i32) {
    %c0_i32 = arith.constant 0 : i32
    %c0_i32_0 = arith.constant 0 : i32
    return %arg0, %c0_i32 : i32, i32
  }
}

</mosaic_0001>

<bundles_post_ra>
// kernel: tpu_custom_call.1
= control target key start
LH: loop header
LB: loop body
LE: loop exit
PB: predicated region body
PF: predicated region fallthrough
CT: control target
= control target key end

     0   :  { %8 = vsyncpa [#allocation3], 0  ;;  %s1449_s0 = inlined_call_operand.hbm [shape: f32[256,128], index: 0, kind: input, shape index: {}]   ;;  %s1450_s1 = inlined_call_operand.hbm [shape: f32[128,256], index: 1, kind: input, shape index: {}]   ;;  %s1451_s2 = inlined_call_operand.vmem [shape: f32[1,256], index: 2, kind: input, shape index: {}]   ;;  %s1452_s3 = inlined_call_operand.hbm [shape: f32[256,128], index: 3, kind: output, shape index: {}]  }
   0x1   :  { %10 = vsyncpa [#allocation3 + $0x1], 0 }
   0x2   :  { %11 = vsyncpa [#allocation6], 0 }
   0x3   :  { %12 = vsyncpa [#allocation4], 0 }
   0x4   :  { %14 = vsyncpa [#allocation4 + $0x1], 0  ;;  %s1048_s12 = smov 0   ;;  %s1050_s13 = smov 0  }
   0x5   :  { %s1052_s14 = smov 0   ;;  %s1054_s15 = smov 0  }
   0x6 LB: > { %s1069_s16 = sadd.s32 4294967295, %s1016_s15   ;;  %s700_s17 = sadd.s32 4294967294, %s1016_s15   ;;  %s1016_s15 = sphi %s1054_s15, %s1474_s15   ;;  %s1012_s14 = sphi %s1052_s14, %s1473_s14   ;;  %s1008_s13 = sphi %s1050_s13, %s1472_s13   ;;  %s1004_s12 = sphi %s1048_s12, %s1471_s12  }
   0x7   : > { %p40_p0 = scmp.ne.s32.totalorder %s1008_s13, %s1004_s12  ;;  %p1453_p1 = scmp.eq.s32.totalorder %s1069_s16, 0 }
   0x8   : > { %p112_p3 = scmp.eq.s32.totalorder %s700_s17, 1  ;;  %p701_p5 = scmp.ge.s32.totalorder %s1016_s15, 1 }
   0x9   : > { %p1078_p4 = por %p1453_p1, %p40_p0  ;;  %p119_p7 = scmp.lt.s32.totalorder %s1016_s15, 3 }
   0xa   : > { %p1083_p6 = por %p112_p3, %p40_p0  ;;  %s1018_s21 = smov [#allocation5]  }
   0xb   : > { %s1457_s18 = scalar_select %p1078_p4, 1, 0 }
   0xc   : > { %s1458_s19 = scalar_select %p1083_p6, 1, 0 }
   0xd   : > { %p1088_p8 = pnand %p701_p5, %p119_p7  ;;  %s131_s22 = sshll.u32 %s1018_s21, 4  ;;  %s132_s22 = int_to_ptr.vmem [resolvable:$true] %s131_s22 }
   0xe   : > { %s1102_s24 = sadd.s32 1, %s1016_s15   ;;  %s27_s25 = sadd.s32 1, %s1012_s14 }
   0xf   : > { %s1459_s20 = scalar_select %p1088_p8, 1, 0 }
  0x10   : > { %p774_p9 = pneg %p1088_p8  ;;  %s24_s26 = ssub.s32 %s1016_s15, %s1102_s24 }
  0x11   : > { %s905_s27 = scalar_lea.vmem %s132_s22, 4096  ;;  %p913_p5 = scmp.lt.s32.totalorder %s132_s22, %s132_s22 }
  0x12   : > { %p1097_p11 = pnand %p774_p9, %p1453_p1  ;;  %p906_p13 = scmp.ne.s32.totalorder %s132_s22, %s905_s27 }
  0x13   : > { %p914_p7 = scmp.lt.s32.totalorder %s905_s27, %s905_s27 }
  0x14   : > { %p896_p12 = pneg %p1097_p11 }
  0x15   : > { %p915_p10 = por %p914_p7, %p913_p5 }
  0x16   : > { %p908_p0 = pnand %p906_p13, %p896_p12 }
  0x18   : > { %p909_p3 = pneg %p908_p0 }
  0x1a   : > { %p916_p2 = pnand %p915_p10, %p909_p3 }
  0x1c   : > { %919 = shalt.err (!%p916_p2)
}
  0x1d   : > { %s1019_s28 = smov 256   ;;  %s1020_s29 = smov 16  }
  0x1e   : > { %777 = dma.hbm_to_vmem [thread:$0]  (!%p1097_p11), %s1450_s1, 4096, %s132_s22, [#allocation6], %s1019_s28, %s1019_s28, %s1020_s29  }
  0x1f   : > { %p25_p9 = scmp.eq.s32.totalorder %s24_s26, 0  ;;  %p34_p12 = scmp.ne.s32.totalorder %s1012_s14, %s1008_s13 }
  0x20   : > { %p35_p10 = scmp.eq.s32.totalorder %s1016_s15, 0  ;;  %p787_p2 = scmp.lt.s32.totalorder %s1016_s15, 2 }
  0x21   : > { %s1119_s5 = scalar_select %p25_p9, %s1012_s14, %s27_s25  }
  0x22   : > { %p36_p13 = por %p35_p10, %p34_p12  ;;  %p1461_p0 = scmp.eq.s32.totalorder %s1069_s16, 1 }
  0x23   : > { %s148_s7 = sand.u32 1, %s1012_s14   ;;  %s732_s8 = sshll.u32 %s1016_s15, 11 }
  0x24   : > { %p1123_p3 = por %p1461_p0, %p34_p12  ;;  %s704_s9 = sshll.u32 %s148_s7, 7 }
  0x25   : > { %s1132_s17 = scalar_lea.hbm %s1449_s0, %s732_s8  ;;  %s152_s21 = scalar_lea.vmem [#allocation2], %s704_s9 }
  0x26   : > { %s1462_s6 = scalar_select %p1123_p3, 1, 0 }
  0x27   : > { %s159_s22 = sshll.u32 %s152_s21, 4  ;;  %p1134_p11 = pnand %p787_p2, %p36_p13  ;;  %s1138_s22 = int_to_ptr.vmem [resolvable:$true] %s159_s22 }
  0x28   : > { %s1140_s25 = scalar_lea.sflag [#allocation3], %s148_s7  ;;  %s920_s26 = scalar_lea.hbm %s1132_s17, 2048 }
  0x29   : > { %p921_p5 = scmp.ne.s32.totalorder %s1132_s17, %s920_s26  ;;  %p922_p7 = pneg %p1134_p11 }
  0x2a   : > { %s925_s29 = scalar_lea.hbm %s1449_s0, 4096  ;;  %p926_p10 = scmp.lt.s32.totalorder %s1132_s17, %s1449_s0 }
  0x2b   : > { %p923_p9 = pnand %p922_p7, %p921_p5  ;;  %p927_p2 = scmp.lt.s32.totalorder %s925_s29, %s920_s26 }
  0x2d   : > { %p924_p12 = pneg %p923_p9  ;;  %p928_p13 = por %p927_p2, %p926_p10 }
  0x2f   : > { %p929_p0 = pnand %p928_p13, %p924_p12 }
  0x31   : > { %932 = shalt.err (!%p929_p0)
}
  0x32   : > { %s933_s7 = scalar_lea.vmem %s1138_s22, 2048  ;;  %s1021_s8 = smov [#allocation2]  }
  0x33   : > { %p934_p1 = scmp.ne.s32.totalorder %s1138_s22, %s933_s7  ;;  %s938_s9 = sshll.u32 %s1021_s8, 4  ;;  %s939_s9 = int_to_ptr.vmem [resolvable:$false] %s938_s9 }
  0x34   : > { %s940_s10 = scalar_lea.vmem %s939_s9, 4096  ;;  %p941_p9 = scmp.lt.s32.totalorder %s1138_s22, %s939_s9 }
  0x35   : > { %p936_p6 = pnand %p934_p1, %p922_p7  ;;  %p942_p3 = scmp.lt.s32.totalorder %s940_s10, %s933_s7 }
  0x37   : > { %p937_p5 = pneg %p936_p6  ;;  %p943_p4 = por %p942_p3, %p941_p9 }
  0x39   : > { %p944_p8 = pnand %p943_p4, %p937_p5 }
  0x3b   : > { %947 = shalt.err (!%p944_p8)
}
  0x3c   : > { %s1022_s11 = smov 128   ;;  %s1023_s21 = smov 8  }
  0x3d   : > { %781 = dma.hbm_to_vmem [thread:$0]  (!%p1134_p11), %s1132_s17, 2048, %s1138_s22, %s1140_s25, %s1022_s11, %s1022_s11, %s1023_s21  }
  0x3e   : > { %p1464_p1 = scmp.ne.s32.totalorder %s1459_s20, 0 }
  0x3f   : > { %s1164_s26 = sand.u32 (!%p1464_p1), 1, %s1008_s13   ;;  %p1465_p4 = scmp.ne.s32.totalorder (!%p1464_p1), %s1457_s18, 0 }
  0x40   : > { %171 = sbr.rel (%p1464_p1) target bundleno = 385 (0x181), region = 32  ;;  %s708_s27 = sshll.u32 (!%p1464_p1), %s1164_s26, 7 }
  0x41   : > { %s174_s28 = scalar_lea.sflag (!%p1464_p1), [#allocation3], %s1164_s26  ;;  %s1170_s29 = scalar_lea.vmem (!%p1464_p1), [#allocation2], %s708_s27 }
  0x45   : > { %991 = dma.done.wait (%p1465_p4), %s174_s28, 2048  }
  0x46   : > { %993 = vsyncadd (%p1465_p4), %s174_s28, 4294965248  ;;  %p1466_p6 = scmp.eq.s32.totalorder %s1069_s16, 0 }
  0x48   : > { %995 = dma.done.wait (%p1466_p6), [#allocation6], 4096   ;;  %p1467_p8 = pmov %p1466_p6 }
  0x49   : > { %v1024_v0 = vmov 0.0   ;;  %v253_v1 = vld [vmem:[#allocation5 + $0xf8] sm:$0xff]  ;;  %v252_v2 = vld [vmem:[#allocation5 + $0xf0] sm:$0xff]  ;;  %v251_v3 = vld [vmem:[#allocation5 + $0xe8] sm:$0xff]  ;;  %v256_v49 = vlaneseq  ;;  %s1339_s17 = scalar_lea.vmem [#allocation7], %s708_s27  ;;  %s733_s22 = sshll.u32 %s1069_s16, 11 }
  0x4a   : > { %997 = vsyncadd (%p1467_p8), [#allocation6], 4294963200  ;;  %330 = vmatprep.mubr.f32.mxu0 %v1024_v0  ;;  %378 = vmatprep.mubr.f32.mxu1 %v1024_v0  ;;  %v250_v4 = vld [vmem:[#allocation5 + $0xe0] sm:$0xff]  ;;  %v249_v5 = vld [vmem:[#allocation5 + $0xd8] sm:$0xff]  ;;  %s617_s23 = sshll.u32 %s1339_s17, 4  ;;  %s1401_s4 = scalar_lea.hbm %s1452_s3, %s733_s22  ;;  %s1403_s23 = int_to_ptr.vmem [resolvable:$true] %s617_s23 }
  0x4b   : > { %266 = vmatprep.subr.mxu0 %v253_v1  ;;  %734 = vmatprep.subr.mxu1 %v253_v1  ;;  %v248_v6 = vld [vmem:[#allocation5 + $0xd0] sm:$0xff]  ;;  %v247_v7 = vld [vmem:[#allocation5 + $0xc8] sm:$0xff]  ;;  %v246_v8 = vld [vmem:[#allocation5 + $0xc0] sm:$0xff]  ;;  %v257_v50 = vshrl.u32 %v256_v49, 7  ;;  %s604_s16 = scalar_lea.sflag [#allocation4], %s1164_s26  ;;  %s948_s7 = scalar_lea.vmem %s1403_s23, 2048 }
  0x4c   : > { %267 = vmatpush1.msra.mxu0 %v252_v2  ;;  %750 = vmatpush1.msra.mxu1 %v252_v2  ;;  %v245_v9 = vld [vmem:[#allocation5 + $0xb8] sm:$0xff]  ;;  %v244_v10 = vld [vmem:[#allocation5 + $0xb0] sm:$0xff]  ;;  %v243_v11 = vld [vmem:[#allocation5 + $0xa8] sm:$0xff]  ;;  %p949_p3 = scmp.ne.s32.totalorder %s1403_s23, %s948_s7  ;;  %p1468_p11 = scmp.ne.s32.totalorder %s1462_s6, 0 }
  0x4d   : > { %268 = vmatprep.subr.mxu0 %v251_v3  ;;  %735 = vmatprep.subr.mxu1 %v251_v3  ;;  %v242_v12 = vld [vmem:[#allocation5 + $0xa0] sm:$0xff]  ;;  %v241_v13 = vld [vmem:[#allocation5 + $0x98] sm:$0xff]  ;;  %v240_v14 = vld [vmem:[#allocation5 + $0x90] sm:$0xff]  ;;  %v262_v51 = vsub.s32 1, %v257_v50  ;;  %s1025_s8 = smov [#allocation7]  }
  0x4e   : > { %269 = vmatpush1.msra.mxu0 %v250_v4  ;;  %751 = vmatpush1.msra.mxu1 %v250_v4  ;;  %v239_v15 = vld [vmem:[#allocation5 + $0x88] sm:$0xff]  ;;  %v238_v16 = vld [vmem:[#allocation5 + $0x80] sm:$0xff]  ;;  %v237_v17 = vld [vmem:[#allocation5 + $0x78] sm:$0xff]  ;;  %p950_p7 = pnand %p949_p3, %p1468_p11  ;;  %s952_s9 = sshll.u32 %s1025_s8, 4  ;;  %s953_s9 = int_to_ptr.vmem [resolvable:$false] %s952_s9 }
  0x4f   : > { %270 = vmatprep.subr.mxu0 %v249_v5  ;;  %736 = vmatprep.subr.mxu1 %v249_v5  ;;  %v236_v18 = vld [vmem:[#allocation5 + $0x70] sm:$0xff]  ;;  %v235_v19 = vld [vmem:[#allocation5 + $0x68] sm:$0xff]  ;;  %v234_v20 = vld [vmem:[#allocation5 + $0x60] sm:$0xff]  ;;  %s954_s10 = scalar_lea.vmem %s953_s9, 4096  ;;  %p955_p10 = scmp.lt.s32.totalorder %s1403_s23, %s953_s9 }
  0x50   : > { %271 = vmatpush1.msra.mxu0 %v248_v6  ;;  %752 = vmatpush1.msra.mxu1 %v248_v6  ;;  %v233_v21 = vld [vmem:[#allocation5 + $0x58] sm:$0xff]  ;;  %v232_v22 = vld [vmem:[#allocation5 + $0x50] sm:$0xff]  ;;  %v231_v23 = vld [vmem:[#allocation5 + $0x48] sm:$0xff]  ;;  %p951_p12 = pneg %p950_p7  ;;  %p956_p2 = scmp.lt.s32.totalorder %s954_s10, %s948_s7 }
  0x51   : > { %272 = vmatprep.subr.mxu0 %v247_v7  ;;  %737 = vmatprep.subr.mxu1 %v247_v7  ;;  %v230_v24 = vld [vmem:[#allocation5 + $0x40] sm:$0xff]  ;;  %v229_v25 = vld [vmem:[#allocation5 + $0x38] sm:$0xff]  ;;  %v228_v26 = vld [vmem:[#allocation5 + $0x30] sm:$0xff] }
  0x52   : > { %273 = vmatpush1.msra.mxu0 %v246_v8  ;;  %753 = vmatpush1.msra.mxu1 %v246_v8  ;;  %v227_v27 = vld [vmem:[#allocation5 + $0x28] sm:$0xff]  ;;  %v226_v28 = vld [vmem:[#allocation5 + $0x20] sm:$0xff]  ;;  %v225_v29 = vld [vmem:[#allocation5 + $0x18] sm:$0xff]  ;;  %p957_p13 = por %p956_p2, %p955_p10 }
  0x53   : > { %274 = vmatprep.subr.mxu0 %v245_v9  ;;  %738 = vmatprep.subr.mxu1 %v245_v9  ;;  %v224_v30 = vld [vmem:[#allocation5 + $0x10] sm:$0xff]  ;;  %v223_v31 = vld [vmem:[#allocation5 + $0x8] sm:$0xff]  ;;  %v222_v32 = vld [vmem:[#allocation5] sm:$0xff] }
  0x54   : > { %275 = vmatpush1.msra.mxu0 %v244_v10  ;;  %754 = vmatpush1.msra.mxu1 %v244_v10  ;;  %v1183_v33 = vld [vmem:[%s1170_s29] sm:$0xff]  ;;  %v1193_v35 = vld [vmem:[%s1170_s29 + $0x8] sm:$0xff]  ;;  %v1203_v37 = vld [vmem:[%s1170_s29 + $0x10] sm:$0xff]  ;;  %p958_p0 = pnand %p957_p13, %p951_p12 }
  0x55   : > { %276 = vmatprep.subr.mxu0 %v243_v11  ;;  %739 = vmatprep.subr.mxu1 %v243_v11  ;;  %v1186_v34 = vld [vmem:[%s1170_s29 + $0x40] sm:$0xff]  ;;  %v1196_v36 = vld [vmem:[%s1170_s29 + $0x48] sm:$0xff]  ;;  %v1206_v38 = vld [vmem:[%s1170_s29 + $0x50] sm:$0xff] }
  0x56   : > { %277 = vmatpush1.msra.mxu0 %v242_v12  ;;  %755 = vmatpush1.msra.mxu1 %v242_v12  ;;  %v1213_v39 = vld [vmem:[%s1170_s29 + $0x18] sm:$0xff]  ;;  %v1223_v41 = vld [vmem:[%s1170_s29 + $0x20] sm:$0xff]  ;;  %v1233_v43 = vld [vmem:[%s1170_s29 + $0x28] sm:$0xff] }
  0x57   : > { %278 = vmatprep.subr.mxu0 %v241_v13  ;;  %740 = vmatprep.subr.mxu1 %v241_v13  ;;  %v1216_v40 = vld [vmem:[%s1170_s29 + $0x58] sm:$0xff]  ;;  %v1226_v42 = vld [vmem:[%s1170_s29 + $0x60] sm:$0xff]  ;;  %v1236_v44 = vld [vmem:[%s1170_s29 + $0x68] sm:$0xff] }
  0x58   : > { %279 = vmatpush1.msra.mxu0 %v240_v14  ;;  %756 = vmatpush1.msra.mxu1 %v240_v14  ;;  %v1243_v45 = vld [vmem:[%s1170_s29 + $0x30] sm:$0xff]  ;;  %v1253_v47 = vld [vmem:[%s1170_s29 + $0x38] sm:$0xff]  ;;  %v254_v52 = vld [vmem:[%s1451_s2] sm:$0x3] }
  0x59   : > { %280 = vmatprep.subr.mxu0 %v239_v15  ;;  %741 = vmatprep.subr.mxu1 %v239_v15  ;;  %v1246_v46 = vld [vmem:[%s1170_s29 + $0x70] sm:$0xff]  ;;  %v1256_v48 = vld [vmem:[%s1170_s29 + $0x78] sm:$0xff]  ;;  %v1263_v53 = vrot.slane %v254_v52, %v262_v51 }
  0x5a   : > { %281 = vmatpush1.msra.mxu0 %v238_v16  ;;  %757 = vmatpush1.msra.mxu1 %v238_v16 }
  0x5b   : > { %282 = vmatprep.subr.mxu0 %v237_v17  ;;  %742 = vmatprep.subr.mxu1 %v237_v17 }
  0x5c   : > { %283 = vmatpush1.msra.mxu0 %v236_v18  ;;  %758 = vmatpush1.msra.mxu1 %v236_v18 }
  0x5d   : > { %284 = vmatprep.subr.mxu0 %v235_v19  ;;  %743 = vmatprep.subr.mxu1 %v235_v19 }
  0x5e   : > { %285 = vmatpush1.msra.mxu0 %v234_v20  ;;  %759 = vmatpush1.msra.mxu1 %v234_v20 }
  0x5f   : > { %286 = vmatprep.subr.mxu0 %v233_v21  ;;  %744 = vmatprep.subr.mxu1 %v233_v21 }
  0x60   : > { %287 = vmatpush1.msra.mxu0 %v232_v22  ;;  %760 = vmatpush1.msra.mxu1 %v232_v22 }
  0x61   : > { %288 = vmatprep.subr.mxu0 %v231_v23  ;;  %745 = vmatprep.subr.mxu1 %v231_v23 }
  0x62   : > { %289 = vmatpush1.msra.mxu0 %v230_v24  ;;  %761 = vmatpush1.msra.mxu1 %v230_v24 }
  0x63   : > { %290 = vmatprep.subr.mxu0 %v229_v25  ;;  %746 = vmatprep.subr.mxu1 %v229_v25 }
  0x64   : > { %291 = vmatpush1.msra.mxu0 %v228_v26  ;;  %762 = vmatpush1.msra.mxu1 %v228_v26  ;;  %v258_v26 = vsub.s32 0, %v257_v50 }
  0x65   : > { %292 = vmatprep.subr.mxu0 %v227_v27  ;;  %747 = vmatprep.subr.mxu1 %v227_v27 }
  0x66   : > { %293 = vmatpush1.msra.mxu0 %v226_v28  ;;  %763 = vmatpush1.msra.mxu1 %v226_v28 }
  0x67   : > { %294 = vmatprep.subr.mxu0 %v225_v29  ;;  %748 = vmatprep.subr.mxu1 %v225_v29 }
  0x68   : > { %295 = vmatpush1.msra.mxu0 %v224_v30  ;;  %764 = vmatpush1.msra.mxu1 %v224_v30 }
  0x69   : > { %296 = vmatprep.subr.mxu0 %v223_v31  ;;  %749 = vmatprep.subr.mxu1 %v223_v31 }
  0x6a   : > { %297 = vmatpush1.msra.mxu0 %v222_v32  ;;  %765 = vmatpush1.msra.mxu1 %v222_v32 }
  0x6b   : > { %331 = vmatmul.mubr.f32.vlgmr.msra.gmra.mxu0 %v1183_v33  ;;  %379 = vmatmul.mubr.f32.vlgmr.msra.gmra.mxu1 %v1186_v34 }
  0x6c   : > { %336 = vmatprep.mubr.f32.mxu0 %v1024_v0  ;;  %384 = vmatprep.mubr.f32.mxu1 %v1024_v0 }
  0x6f   : > { %337 = vmatmul.mubr.f32.gmra.mxu0 %v1193_v35  ;;  %385 = vmatmul.mubr.f32.gmra.mxu1 %v1196_v36 }
  0x70   : > { %342 = vmatprep.mubr.f32.mxu0 %v1024_v0  ;;  %390 = vmatprep.mubr.f32.mxu1 %v1024_v0 }
  0x73   : > { %343 = vmatmul.mubr.f32.gmra.mxu0 %v1203_v37  ;;  %391 = vmatmul.mubr.f32.gmra.mxu1 %v1206_v38 }
  0x74   : > { %348 = vmatprep.mubr.f32.mxu0 %v1024_v0  ;;  %396 = vmatprep.mubr.f32.mxu1 %v1024_v0 }
  0x77   : > { %349 = vmatmul.mubr.f32.gmra.mxu0 %v1213_v39  ;;  %397 = vmatmul.mubr.f32.gmra.mxu1 %v1216_v40 }
  0x78   : > { %354 = vmatprep.mubr.f32.mxu0 %v1024_v0  ;;  %402 = vmatprep.mubr.f32.mxu1 %v1024_v0 }
  0x7b   : > { %355 = vmatmul.mubr.f32.gmra.mxu0 %v1223_v41  ;;  %403 = vmatmul.mubr.f32.gmra.mxu1 %v1226_v42 }
  0x7c   : > { %360 = vmatprep.mubr.f32.mxu0 %v1024_v0  ;;  %408 = vmatprep.mubr.f32.mxu1 %v1024_v0 }
  0x7f   : > { %361 = vmatmul.mubr.f32.gmra.mxu0 %v1233_v43  ;;  %409 = vmatmul.mubr.f32.gmra.mxu1 %v1236_v44 }
  0x80   : > { %366 = vmatprep.mubr.f32.mxu0 %v1024_v0  ;;  %414 = vmatprep.mubr.f32.mxu1 %v1024_v0 }
  0x83   : > { %367 = vmatmul.mubr.f32.gmra.mxu0 %v1243_v45  ;;  %415 = vmatmul.mubr.f32.gmra.mxu1 %v1246_v46 }
  0x84   : > { %372 = vmatprep.mubr.f32.mxu0 %v1024_v0  ;;  %420 = vmatprep.mubr.f32.mxu1 %v1024_v0 }
  0x87   : > { %373 = vmatmul.mubr.f32.gmra.mxu0 %v1253_v47  ;;  %421 = vmatmul.mubr.f32.gmra.mxu1 %v1256_v48 }
 0x12b   : > { %v1265_v54 = vpop.f32.mrf.mxu0  ;;  %v1267_v55 = vpop.f32.mrf.mxu1 }
 0x12d   : > { %v334_v56 = vpop.f32.mrf.mxu0  ;;  %v382_v57 = vpop.f32.mrf.mxu1 }
 0x12e   : > { %v335_v58 = vadd.f32 %v334_v56, %v1263_v53  ;;  %v383_v59 = vadd.f32 %v382_v57, %v1263_v53 }
 0x12f   : > { %v1271_v60 = vpop.f32.mrf.mxu0  ;;  %v1273_v61 = vpop.f32.mrf.mxu1 }
 0x130   : > { %v711_v62 = vmul.f32 -1.442695, %v335_v58  ;;  %v719_v63 = vmul.f32 -1.442695, %v383_v59 }
 0x131   : > { %v340_v0 = vpop.f32.mrf.mxu0  ;;  %v388_v1 = vpop.f32.mrf.mxu1 }
 0x132   : > { %830 = vpow2.f32 %v711_v62  ;;  %v341_v2 = vadd.f32 %v340_v0, %v1263_v53  ;;  %v389_v3 = vadd.f32 %v388_v1, %v1263_v53  ;;  %v1299_v62 = vrot.slane %v254_v52, %v258_v26 }
 0x133   : > { %832 = vpow2.f32 %v719_v63  ;;  %v1277_v4 = vpop.f32.mrf.mxu0  ;;  %v1279_v5 = vpop.f32.mrf.mxu1 }
 0x134   : > { %v712_v6 = vmul.f32 -1.442695, %v341_v2  ;;  %v720_v7 = vmul.f32 -1.442695, %v389_v3 }
 0x135   : > { %v346_v8 = vpop.f32.mrf.mxu0  ;;  %v394_v9 = vpop.f32.mrf.mxu1 }
 0x136   : > { %834 = vpow2.f32 %v712_v6  ;;  %v347_v10 = vadd.f32 %v346_v8, %v1263_v53  ;;  %v395_v11 = vadd.f32 %v394_v9, %v1263_v53 }
 0x137   : > { %836 = vpow2.f32 %v720_v7  ;;  %v1283_v12 = vpop.f32.mrf.mxu0  ;;  %v1285_v13 = vpop.f32.mrf.mxu1 }
 0x138   : > { %v713_v14 = vmul.f32 -1.442695, %v347_v10  ;;  %v721_v15 = vmul.f32 -1.442695, %v395_v11  ;;  %v333_v11 = vadd.f32 %v1265_v54, %v1299_v62  ;;  %v387_v54 = vadd.f32 %v1273_v61, %v1299_v62 }
 0x139   : > { %v352_v16 = vpop.f32.mrf.mxu0  ;;  %v400_v17 = vpop.f32.mrf.mxu1 }
 0x13a   : > { %838 = vpow2.f32 %v713_v14  ;;  %v353_v18 = vadd.f32 %v352_v16, %v1263_v53  ;;  %v401_v19 = vadd.f32 %v400_v17, %v1263_v53  ;;  %v381_v16 = vadd.f32 %v1267_v55, %v1299_v62 }
 0x13b   : > { %840 = vpow2.f32 %v721_v15  ;;  %v1289_v20 = vpop.f32.mrf.mxu0  ;;  %v1291_v21 = vpop.f32.mrf.mxu1 }
 0x13c   : > { %v714_v22 = vmul.f32 -1.442695, %v353_v18  ;;  %v722_v23 = vmul.f32 -1.442695, %v401_v19 }
 0x13d   : > { %v358_v24 = vpop.f32.mrf.mxu0  ;;  %v406_v25 = vpop.f32.mrf.mxu1 }
 0x13e   : > { %842 = vpow2.f32 %v714_v22  ;;  %v359_v27 = vadd.f32 %v358_v24, %v1263_v53  ;;  %v407_v28 = vadd.f32 %v406_v25, %v1263_v53 }
 0x13f   : > { %v831_v29 = vpop.eup %830  ;;  %844 = vpow2.f32 %v722_v23  ;;  %v1295_v30 = vpop.f32.mrf.mxu0  ;;  %v339_v23 = vadd.f32 %v1271_v60, %v1299_v62 }
 0x140   : > { %v1297_v31 = vpop.f32.mrf.mxu1  ;;  %v833_v32 = vpop.eup %832  ;;  %v491_v49 = vadd.f32 1.0, %v831_v29  ;;  %v715_v51 = vmul.f32 -1.442695, %v359_v27  ;;  %v723_v57 = vmul.f32 -1.442695, %v407_v28  ;;  %v427_v29 = vmax.f32 %v333_v11, 0.0 }
 0x141   : > { %v499_v56 = vadd.f32 1.0, %v833_v32  ;;  %v364_v58 = vpop.f32.mrf.mxu0 }
 0x142   : > { %v412_v59 = vpop.f32.mrf.mxu1  ;;  %846 = vrcp.f32 %v491_v49  ;;  %v365_v50 = vadd.f32 %v364_v58, %v1263_v53  ;;  %v435_v49 = vmax.f32 %v381_v16, 0.0  ;;  %v436_v58 = vmax.f32 %v387_v54, 0.0 }
 0x143   : > { %v413_v63 = vadd.f32 %v412_v59, %v1263_v53  ;;  %v835_v0 = vpop.eup %834  ;;  %848 = vrcp.f32 %v499_v56  ;;  %v1303_v1 = vpop.f32.mrf.mxu0 }
 0x144   : > { %v1305_v2 = vpop.f32.mrf.mxu1  ;;  %v837_v3 = vpop.eup %836  ;;  %v492_v6 = vadd.f32 1.0, %v835_v0  ;;  %850 = vpow2.f32 %v715_v51  ;;  %v716_v7 = vmul.f32 -1.442695, %v365_v50  ;;  %v345_v0 = vadd.f32 %v1277_v4, %v1299_v62 }
 0x145   : > { %v500_v8 = vadd.f32 1.0, %v837_v3  ;;  %852 = vpow2.f32 %v723_v57  ;;  %v724_v9 = vmul.f32 -1.442695, %v413_v63  ;;  %v370_v52 = vpop.f32.mrf.mxu0  ;;  %v428_v57 = vmax.f32 %v339_v23, 0.0 }
 0x146   : > { %v418_v10 = vpop.f32.mrf.mxu1  ;;  %854 = vrcp.f32 %v492_v6  ;;  %v371_v14 = vadd.f32 %v370_v52, %v1263_v53  ;;  %v539_v63 = vsub.f32 %v427_v29, %v1183_v33  ;;  %v429_v16 = vmax.f32 %v345_v0, 0.0 }
 0x147   : > { %v839_v15 = vpop.eup %838  ;;  %856 = vrcp.f32 %v500_v8  ;;  %v419_v17 = vadd.f32 %v418_v10, %v1263_v53  ;;  %v1313_v18 = vpop.f32.mrf.mxu0  ;;  %v540_v11 = vsub.f32 %v428_v57, %v1193_v35 }
 0x148   : > { %v1315_v19 = vpop.f32.mrf.mxu1  ;;  %v841_v22 = vpop.eup %840  ;;  %v493_v24 = vadd.f32 1.0, %v839_v15  ;;  %858 = vpow2.f32 %v716_v7  ;;  %v717_v26 = vmul.f32 -1.442695, %v371_v14  ;;  %v547_v7 = vsub.f32 %v435_v49, %v1186_v34 }
 0x149   : > { %v501_v25 = vadd.f32 1.0, %v841_v22  ;;  %860 = vpow2.f32 %v724_v9  ;;  %v725_v55 = vmul.f32 -1.442695, %v419_v17  ;;  %v376_v27 = vpop.f32.mrf.mxu0  ;;  %v548_v14 = vsub.f32 %v436_v58, %v1196_v36 }
 0x14a   : > { %v424_v28 = vpop.f32.mrf.mxu1  ;;  %862 = vrcp.f32 %v493_v24  ;;  %v377_v51 = vadd.f32 %v376_v27, %v1263_v53  ;;  %v351_v17 = vadd.f32 %v1283_v12, %v1299_v62  ;;  %v399_v24 = vadd.f32 %v1285_v13, %v1299_v62 }
 0x14b   : > { %v843_v32 = vpop.eup %842  ;;  %864 = vrcp.f32 %v501_v25  ;;  %v425_v60 = vadd.f32 %v424_v28, %v1263_v53  ;;  %v393_v53 = vadd.f32 %v1279_v5, %v1299_v62  ;;  %v541_v13 = vsub.f32 %v429_v16, %v1203_v37 }
 0x14c   : > { %v845_v56 = vpop.eup %844  ;;  %v494_v61 = vadd.f32 1.0, %v843_v32  ;;  %866 = vpow2.f32 %v717_v26  ;;  %v718_v50 = vmul.f32 -1.442695, %v377_v51  ;;  %v430_v28 = vmax.f32 %v351_v17, 0.0 }
 0x14d   : > { %v502_v59 = vadd.f32 1.0, %v845_v56  ;;  %868 = vpow2.f32 %v725_v55  ;;  %v726_v3 = vmul.f32 -1.442695, %v425_v60  ;;  %v437_v54 = vmax.f32 %v393_v53, 0.0 }
 0x14e   : > { %870 = vrcp.f32 %v494_v61  ;;  %v438_v60 = vmax.f32 %v399_v24, 0.0  ;;  %v357_v58 = vadd.f32 %v1289_v20, %v1299_v62  ;;  %v542_v0 = vsub.f32 %v430_v28, %v1213_v39 }
 0x14f   : > { %v847_v6 = vpop.eup %846  ;;  %872 = vrcp.f32 %v502_v59  ;;  %v549_v51 = vsub.f32 %v437_v54, %v1206_v38 }
 0x150   : > { %v849_v8 = vpop.eup %848  ;;  %v555_v9 = vmul.f32 %v847_v6, %v539_v63  ;;  %874 = vpow2.f32 %v718_v50  ;;  %v405_v50 = vadd.f32 %v1291_v21, %v1299_v62  ;;  %v550_v20 = vsub.f32 %v438_v60, %v1216_v40 }
 0x151   : > { %v851_v52 = vpop.eup %850  ;;  %v563_v10 = vmul.f32 %v849_v8, %v547_v7  ;;  %876 = vpow2.f32 %v726_v3  ;;  %v363_v21 = vadd.f32 %v1295_v30, %v1299_v62 }
 0x152   : > { %v853_v4 = vpop.eup %852  ;;  %v571_v15 = vadd.f32 %v555_v9, %v1183_v33  ;;  %v495_v5 = vadd.f32 1.0, %v851_v52  ;;  %v431_v52 = vmax.f32 %v357_v58, 0.0 }
 0x153   : > { %v855_v22 = vpop.eup %854  ;;  %v579_v23 = vadd.f32 %v563_v10, %v1186_v34  ;;  %v503_v25 = vadd.f32 1.0, %v853_v4 }
 0x154   : > { %v857_v26 = vpop.eup %856  ;;  %587 = vst [vmem:[%s1339_s17] sm:$0xff] %v571_v15  ;;  %v556_v33 = vmul.f32 %v855_v22, %v540_v11  ;;  %878 = vrcp.f32 %v495_v5  ;;  %v439_v11 = vmax.f32 %v405_v50, 0.0  ;;  %v543_v30 = vsub.f32 %v431_v52, %v1223_v41 }
 0x155   : > { %v859_v12 = vpop.eup %858  ;;  %595 = vst [vmem:[%s1339_s17 + $0x40] sm:$0xff] %v579_v23  ;;  %v564_v55 = vmul.f32 %v857_v26, %v548_v14  ;;  %880 = vrcp.f32 %v503_v25  ;;  %v432_v5 = vmax.f32 %v363_v21, 0.0  ;;  %v369_v22 = vadd.f32 %v1303_v1, %v1299_v62 }
 0x156   : > { %v861_v34 = vpop.eup %860  ;;  %v572_v27 = vadd.f32 %v556_v33, %v1193_v35  ;;  %v496_v29 = vadd.f32 1.0, %v859_v12  ;;  %v375_v12 = vadd.f32 %v1313_v18, %v1299_v62 }
 0x157   : > { %v863_v32 = vpop.eup %862  ;;  %v580_v49 = vadd.f32 %v564_v55, %v1196_v36  ;;  %v504_v56 = vadd.f32 1.0, %v861_v34  ;;  %v544_v33 = vsub.f32 %v432_v5, %v1233_v43  ;;  %v433_v1 = vmax.f32 %v369_v22, 0.0 }
 0x158   : > { %v865_v57 = vpop.eup %864  ;;  %588 = vst [vmem:[%s1339_s17 + $0x8] sm:$0xff] %v572_v27  ;;  %v557_v61 = vmul.f32 %v863_v32, %v541_v13  ;;  %882 = vrcp.f32 %v496_v29  ;;  %v423_v13 = vadd.f32 %v1315_v19, %v1299_v62 }
 0x159   : > { %v867_v35 = vpop.eup %866  ;;  %596 = vst [vmem:[%s1339_s17 + $0x48] sm:$0xff] %v580_v49  ;;  %v565_v59 = vmul.f32 %v865_v57, %v549_v51  ;;  %884 = vrcp.f32 %v504_v56  ;;  %v545_v18 = vsub.f32 %v433_v1, %v1243_v45  ;;  %v434_v49 = vmax.f32 %v375_v12, 0.0 }
 0x15a   : > { %v869_v36 = vpop.eup %868  ;;  %v573_v63 = vadd.f32 %v557_v61, %v1203_v37  ;;  %v497_v3 = vadd.f32 1.0, %v867_v35 }
 0x15b   : > { %v871_v6 = vpop.eup %870  ;;  %v581_v7 = vadd.f32 %v565_v59, %v1206_v38  ;;  %v505_v53 = vadd.f32 1.0, %v869_v36  ;;  %v411_v38 = vadd.f32 %v1297_v31, %v1299_v62  ;;  %v551_v31 = vsub.f32 %v439_v11, %v1226_v42 }
 0x15c   : > { %v873_v8 = vpop.eup %872  ;;  %589 = vst [vmem:[%s1339_s17 + $0x10] sm:$0xff] %v573_v63  ;;  %v558_v9 = vmul.f32 %v871_v6, %v542_v0  ;;  %886 = vrcp.f32 %v497_v3  ;;  %v546_v61 = vsub.f32 %v434_v49, %v1253_v47 }
 0x15d   : > { %v875_v10 = vpop.eup %874  ;;  %597 = vst [vmem:[%s1339_s17 + $0x50] sm:$0xff] %v581_v7  ;;  %v566_v37 = vmul.f32 %v873_v8, %v550_v20  ;;  %888 = vrcp.f32 %v505_v53  ;;  %v440_v54 = vmax.f32 %v411_v38, 0.0 }
 0x15e   : > { %v877_v14 = vpop.eup %876  ;;  %v574_v4 = vadd.f32 %v558_v9, %v1213_v39  ;;  %v498_v15 = vadd.f32 1.0, %v875_v10  ;;  %v417_v39 = vadd.f32 %v1305_v2, %v1299_v62  ;;  %v442_v62 = vmax.f32 %v423_v13, 0.0 }
 0x15f   : > { %v582_v16 = vadd.f32 %v566_v37, %v1216_v40  ;;  %v506_v17 = vadd.f32 1.0, %v877_v14  ;;  %v552_v27 = vsub.f32 %v440_v54, %v1236_v44 }
 0x160   : > { %590 = vst [vmem:[%s1339_s17 + $0x18] sm:$0xff] %v574_v4  ;;  %890 = vrcp.f32 %v498_v15  ;;  %v441_v2 = vmax.f32 %v417_v39, 0.0  ;;  %v554_v35 = vsub.f32 %v442_v62, %v1256_v48 }
 0x161   : > { %v879_v23 = vpop.eup %878  ;;  %598 = vst [vmem:[%s1339_s17 + $0x58] sm:$0xff] %v582_v16  ;;  %892 = vrcp.f32 %v506_v17 }
 0x162   : > { %v881_v40 = vpop.eup %880  ;;  %v559_v24 = vmul.f32 %v879_v23, %v543_v30  ;;  %v553_v60 = vsub.f32 %v441_v2, %v1246_v46 }
 0x163   : > { %v567_v25 = vmul.f32 %v881_v40, %v551_v31 }
 0x164   : > { %v575_v26 = vadd.f32 %v559_v24, %v1223_v41 }
 0x165   : > { %v883_v55 = vpop.eup %882  ;;  %v583_v34 = vadd.f32 %v567_v25, %v1226_v42 }
 0x166   : > { %v885_v28 = vpop.eup %884  ;;  %591 = vst [vmem:[%s1339_s17 + $0x20] sm:$0xff] %v575_v26  ;;  %v560_v41 = vmul.f32 %v883_v55, %v544_v33 }
 0x167   : > { %599 = vst [vmem:[%s1339_s17 + $0x60] sm:$0xff] %v583_v34  ;;  %v568_v29 = vmul.f32 %v885_v28, %v552_v27 }
 0x168   : > { %v576_v32 = vadd.f32 %v560_v41, %v1233_v43 }
 0x169   : > { %v887_v42 = vpop.eup %886  ;;  %v584_v51 = vadd.f32 %v568_v29, %v1236_v44 }
 0x16a   : > { %v889_v19 = vpop.eup %888  ;;  %592 = vst [vmem:[%s1339_s17 + $0x28] sm:$0xff] %v576_v32  ;;  %v561_v56 = vmul.f32 %v887_v42, %v545_v18 }
 0x16b   : > { %600 = vst [vmem:[%s1339_s17 + $0x68] sm:$0xff] %v584_v51  ;;  %v569_v57 = vmul.f32 %v889_v19, %v553_v60 }
 0x16c   : > { %v577_v43 = vadd.f32 %v561_v56, %v1243_v45 }
 0x16d   : > { %v891_v58 = vpop.eup %890  ;;  %v585_v44 = vadd.f32 %v569_v57, %v1246_v46 }
 0x16e   : > { %v893_v59 = vpop.eup %892  ;;  %593 = vst [vmem:[%s1339_s17 + $0x30] sm:$0xff] %v577_v43  ;;  %v562_v50 = vmul.f32 %v891_v58, %v546_v61 }
 0x16f   : > { %601 = vst [vmem:[%s1339_s17 + $0x70] sm:$0xff] %v585_v44  ;;  %v570_v36 = vmul.f32 %v893_v59, %v554_v35 }
 0x170   : > { %v578_v45 = vadd.f32 %v562_v50, %v1253_v47 }
 0x171   : > { %v586_v46 = vadd.f32 %v570_v36, %v1256_v48 }
 0x172   : > { %594 = vst [vmem:[%s1339_s17 + $0x38] sm:$0xff] %v578_v45 }
 0x173   : > { %602 = vst [vmem:[%s1339_s17 + $0x78] sm:$0xff] %v586_v46 }
 0x174   : > { %961 = shalt.err (!%p958_p0)
}
 0x175   : > { %s962_s11 = scalar_lea.hbm %s1401_s4, 2048  ;;  %s966_s28 = scalar_lea.hbm %s1452_s3, 4096 }
 0x176   : > { %p963_p5 = scmp.ne.s32.totalorder %s1401_s4, %s962_s11  ;;  %p967_p4 = scmp.lt.s32.totalorder %s1401_s4, %s1452_s3 }
 0x177   : > { %p968_p6 = scmp.lt.s32.totalorder %s966_s28, %s962_s11 }
 0x178   : > { %p964_p9 = pnand %p963_p5, %p1468_p11 }
 0x179   : > { %p969_p8 = por %p968_p6, %p967_p4 }
 0x17a   : > { %p965_p1 = pneg %p964_p9 }
 0x17c   : > { %p970_p3 = pnand %p969_p8, %p965_p1 }
 0x17e   : > { %973 = shalt.err (!%p970_p3)
}
 0x17f   : > { %s1026_s20 = smov 128   ;;  %s1027_s17 = smov 8  }
 0x180   : > { %772 = dma.vmem_to_hbm [thread:$0]  (%p1468_p11), %s1403_s23, 2048, %s1401_s4, %s604_s16, %s1026_s20, %s1026_s20, %s1027_s17  }
 0x181 PF: > { %s632_s22 = sand.u32 1, %s1004_s12   ;;  %p1469_p7 = scmp.ne.s32.totalorder %s1458_s19, 0 }
 0x182   : > { %p1470_p12 = scmp.ge.s32.totalorder %s1016_s15, 2  ;;  %s633_s25 = scalar_lea.sflag [#allocation4], %s632_s22 }
 0x184   : > { %p783_p10 = pnand %p1470_p12, %p1469_p7 }
 0x186   : > { %p784_p2 = pneg %p783_p10 }
 0x188   : > { %999 = dma.done.wait (%p784_p2), %s633_s25, 2048  }
 0x189   : > { %1001 = vsyncadd (%p784_p2), %s633_s25, 4294965248  ;;  %p17_p13 = scmp.ge.s32.totalorder %s1102_s24, 4   ;;  %s1471_s12 = smov %s1008_s13 }
 0x18a   : > { %s1472_s13 = smov %s1012_s14  ;;  %s1473_s14 = smov %s1119_s5 }
 0x18b   : > { %s1474_s15 = smov %s1102_s24  ;;  %19 = sbr.rel (!%p17_p13) target bundleno = 6 (0x6), region = 81 }
 0x190   :  { %638 = vsyncpa [#allocation3], 1 }
 0x191   :  { %640 = vsyncpa [#allocation3 + $0x1], 1 }
 0x192   :  { %641 = vsyncpa [#allocation6], 1 }
 0x193   :  { %642 = vsyncpa [#allocation4], 1 }
 0x194   :  { %644 = vsyncpa [#allocation4 + $0x1], 1 }

</bundles_post_ra>
